<compile_context>
chip_gen: v7x
topology: tpu7x:2x2x1
jax: 0.10.0
libtpu: 0.0.40
codegen_flags: <defaults>
</compile_context>

<pallas_src>
import functools

import jax
import jax.numpy as jnp
from jax.experimental import pallas as pl
from jax.experimental.pallas import tpu as pltpu


def _round_up(n, m):
    return ((n + m - 1) // m) * m


def _scrnn_seq_kernel(x_ref, h0_ref, c0_ref, WxB_ref, WcV_ref, Wh_ref, U_ref,
                      newh_ref, ctx_ref, h_sc, c_sc, *, alpha, num_units):
    t = pl.program_id(0)

    @pl.when(t == 0)
    def _():
        h_sc[...] = h0_ref[...].astype(jnp.float32)
        c_sc[...] = c0_ref[...].astype(jnp.float32)

    x = x_ref[0].astype(jnp.bfloat16)          # (batch, input_size)
    h = h_sc[...]                              # (batch, num_units)   f32 carry
    c = c_sc[...]                              # (batch, cp)          f32 carry

    # Fused x @ [Wx | B_pad] -> (batch, num_units + cp); one K=input_size matmul.
    xW = jnp.dot(x, WxB_ref[...], preferred_element_type=jnp.float32)
    x_Wx = xW[:, :num_units]
    x_B = xW[:, num_units:]

    # context_state = (1 - alpha) * (x @ B) + alpha * c   (f32; padded cols stay 0)
    ctx = (1.0 - alpha) * x_B + alpha * c

    # h @ Wh  (independent of ctx)
    h_Wh = jnp.dot(h.astype(jnp.bfloat16), Wh_ref[...],
                   preferred_element_type=jnp.float32)

    # Fused ctx @ [Wc_pad | V_pad] -> (batch, 2*num_units); one K=cp matmul.
    ctxW = jnp.dot(ctx.astype(jnp.bfloat16), WcV_ref[...],
                   preferred_element_type=jnp.float32)
    ctx_Wc = ctxW[:, :num_units]
    ctx_V = ctxW[:, num_units:]

    # sigmoid(cat([ctx, x, h]) @ fc.weight.T) == sigmoid(ctx@Wc + x@Wx + h@Wh)
    hid = jax.nn.sigmoid(ctx_Wc + x_Wx + h_Wh)

    new_h = jnp.dot(hid.astype(jnp.bfloat16), U_ref[...],
                    preferred_element_type=jnp.float32) + ctx_V

    newh_ref[0] = new_h.astype(newh_ref.dtype)
    ctx_ref[0] = ctx.astype(ctx_ref.dtype)
    h_sc[...] = new_h
    c_sc[...] = ctx


def _prepare_weights(B, V, U, fc_weight, context_units, input_size, num_units):
    """One-time weight massaging: transpose/split fc, pad context dim, cast bf16."""
    cp = _round_up(context_units, 128)
    pad_c = cp - context_units

    w_t = fc_weight.T                                   # (context + input + num, num)
    Wc = w_t[:context_units]
    Wx = w_t[context_units:context_units + input_size]
    Wh = w_t[context_units + input_size:]

    B_pad = jnp.pad(B, ((0, 0), (0, pad_c)))            # (input, cp)  zero-padded cols
    Wc_pad = jnp.pad(Wc, ((0, pad_c), (0, 0)))          # (cp, num)    zero-padded rows
    V_pad = jnp.pad(V, ((0, pad_c), (0, 0)))            # (cp, num)

    WxB = jnp.concatenate([Wx, B_pad], axis=1).astype(jnp.bfloat16)    # (input, num + cp)
    WcV = jnp.concatenate([Wc_pad, V_pad], axis=1).astype(jnp.bfloat16)  # (cp, 2*num)
    return WxB, WcV, Wh.astype(jnp.bfloat16), U.astype(jnp.bfloat16), cp


def scrnn_sequence_forward(x_seq, h0, c0, B, V, U, fc_weight, *, alpha=0.5):
    """Run the SCRNN cell over a whole sequence in ONE pallas_call.

    x_seq: (T, batch, input_size)   h0: (batch, num_units)   c0: (batch, context_units)
    Returns (new_h_seq (T,batch,num_units), ctx_seq (T,batch,context_units)).
    """
    T, batch, input_size = x_seq.shape
    num_units = h0.shape[1]
    context_units = c0.shape[1]

    WxB, WcV, Wh_bf, U_bf, cp = _prepare_weights(
        B, V, U, fc_weight, context_units, input_size, num_units)

    x_bf = x_seq.astype(jnp.bfloat16)                          # halve x DMA volume
    h0_f = h0.astype(jnp.float32)
    c0_pad = jnp.pad(c0.astype(jnp.float32), ((0, 0), (0, cp - context_units)))

    kernel = functools.partial(_scrnn_seq_kernel, alpha=float(alpha),
                               num_units=num_units)

    newh_seq, ctx_seq = pl.pallas_call(
        kernel,
        out_shape=(jax.ShapeDtypeStruct((T, batch, num_units), x_seq.dtype),
                   jax.ShapeDtypeStruct((T, batch, cp), x_seq.dtype)),
        grid=(T,),
        in_specs=[
            pl.BlockSpec((1, batch, input_size), lambda t: (t, 0, 0)),  # x streamed
            pl.BlockSpec((batch, num_units), lambda t: (0, 0)),         # h0 (resident)
            pl.BlockSpec((batch, cp), lambda t: (0, 0)),                # c0 (resident)
            pl.BlockSpec(WxB.shape, lambda t: (0, 0)),                  # weights resident
            pl.BlockSpec(WcV.shape, lambda t: (0, 0)),
            pl.BlockSpec(Wh_bf.shape, lambda t: (0, 0)),
            pl.BlockSpec(U_bf.shape, lambda t: (0, 0)),
        ],
        out_specs=[
            pl.BlockSpec((1, batch, num_units), lambda t: (t, 0, 0)),
            pl.BlockSpec((1, batch, cp), lambda t: (t, 0, 0)),
        ],
        scratch_shapes=[
            pltpu.VMEM((batch, num_units), jnp.float32),   # h carry
            pltpu.VMEM((batch, cp), jnp.float32),          # c carry
        ],
        compiler_params=pltpu.CompilerParams(
            dimension_semantics=("arbitrary",)),           # sequential recurrence
    )(x_bf, h0_f, c0_pad, WxB, WcV, Wh_bf, U_bf)

    return newh_seq, ctx_seq[:, :, :context_units]


def scrnn_cell_forward(x, h, c, B, V, U, fc_weight, *, alpha=0.5):
    """Single-step forward matching the PyTorch module (T=1 of the fused kernel)."""
    newh_seq, ctx_seq = scrnn_sequence_forward(x[None], h, c, B, V, U, fc_weight,
                                               alpha=alpha)
    return newh_seq[0], ctx_seq[0]


def _xavier_uniform(key, shape, dtype=jnp.float32):
    fan_out, fan_in = shape[0], shape[1]
    bound = (6.0 / (fan_in + fan_out)) ** 0.5
    return jax.random.uniform(key, shape, dtype, minval=-bound, maxval=bound)


def _reference_step(x, h, c, B, V, U, fc_weight, alpha=0.5):
    ctx = (1.0 - alpha) * (x @ B) + alpha * c
    concated = jnp.concatenate([ctx, x, h], axis=1)
    hid = jax.nn.sigmoid(concated @ fc_weight.T)
    return hid @ U + ctx @ V, ctx


if __name__ == "__main__":
    batch = 8
    input_size = 256
    num_units = 128
    context_units = 64
    alpha = 0.5
    T = 4

    key = jax.random.PRNGKey(0)
    k = jax.random.split(key, 7)

    x_seq = jax.random.normal(k[0], (T, batch, input_size), jnp.float32)
    h0 = jax.random.normal(k[1], (batch, num_units), jnp.float32)
    c0 = jax.random.normal(k[2], (batch, context_units), jnp.float32)

    B = _xavier_uniform(k[3], (input_size, context_units))
    V = _xavier_uniform(k[4], (context_units, num_units))
    U = _xavier_uniform(k[5], (num_units, num_units))
    fc_weight = _xavier_uniform(k[6], (num_units, context_units + input_size + num_units))

    # --- single step (exact module forward semantics) ---
    new_h, ctx = scrnn_cell_forward(x_seq[0], h0, c0, B, V, U, fc_weight, alpha=alpha)
    jax.block_until_ready((new_h, ctx))
    ref_h, ref_ctx = _reference_step(x_seq[0], h0, c0, B, V, U, fc_weight, alpha)
    # bf16 MXU operands -> looser tolerance than the f32-everything version.
    assert jnp.allclose(new_h, ref_h, atol=5e-2, rtol=5e-2)
    assert jnp.allclose(ctx, ref_ctx, atol=5e-2, rtol=5e-2)

    # --- fused sequence (one pallas_call for all T steps) ---
    seq_h, seq_ctx = scrnn_sequence_forward(x_seq, h0, c0, B, V, U, fc_weight, alpha=alpha)
    jax.block_until_ready((seq_h, seq_ctx))
    rh, rc = h0, c0
    for t in range(T):
        rh, rc = _reference_step(x_seq[t], rh, rc, B, V, U, fc_weight, alpha)
        assert jnp.allclose(seq_h[t], rh, atol=5e-2, rtol=5e-2)
        assert jnp.allclose(seq_ctx[t], rc, atol=5e-2, rtol=5e-2)

    print("KERNEL_OK")
</pallas_src>

<mosaic_0001>
module attributes {stable_mosaic.version = 11 : i64} {
  func.func @_scrnn_seq_kernel(%arg0: i32, %arg1: memref<1x8x256xbf16, #tpu.memory_space<vmem>>, %arg2: memref<8x128xf32, #tpu.memory_space<vmem>>, %arg3: memref<8x128xf32, #tpu.memory_space<vmem>>, %arg4: memref<256x256xbf16, #tpu.memory_space<vmem>>, %arg5: memref<128x256xbf16, #tpu.memory_space<vmem>>, %arg6: memref<128x128xbf16, #tpu.memory_space<vmem>>, %arg7: memref<128x128xbf16, #tpu.memory_space<vmem>>, %arg8: memref<1x8x128xf32, #tpu.memory_space<vmem>>, %arg9: memref<1x8x128xf32, #tpu.memory_space<vmem>>, %arg10: memref<8x128xf32, #tpu.memory_space<vmem>>, %arg11: memref<8x128xf32, #tpu.memory_space<vmem>>) attributes {dimension_semantics = [#tpu.dimension_semantics<arbitrary>], iteration_bounds = array<i64: 1>, scalar_prefetch = 0 : i64, scratch_operands = 2 : i64, tpu.core_type = #tpu.core_type<tc>, window_params = [{transform_indices = @transform_0, window_bounds = array<i64: 1, 8, 256>}, {pipeline_mode = #tpu.pipeline_mode<synchronous>, transform_indices = @transform_1, window_bounds = array<i64: 8, 128>}, {pipeline_mode = #tpu.pipeline_mode<synchronous>, transform_indices = @transform_2, window_bounds = array<i64: 8, 128>}, {pipeline_mode = #tpu.pipeline_mode<synchronous>, transform_indices = @transform_3, window_bounds = array<i64: 256, 256>}, {pipeline_mode = #tpu.pipeline_mode<synchronous>, transform_indices = @transform_4, window_bounds = array<i64: 128, 256>}, {pipeline_mode = #tpu.pipeline_mode<synchronous>, transform_indices = @transform_5, window_bounds = array<i64: 128, 128>}, {pipeline_mode = #tpu.pipeline_mode<synchronous>, transform_indices = @transform_6, window_bounds = array<i64: 128, 128>}, {transform_indices = @transform_7, window_bounds = array<i64: 1, 8, 128>}, {transform_indices = @transform_8, window_bounds = array<i64: 1, 8, 128>}]} {
    %c0_i32 = arith.constant 0 : i32
    %0 = arith.cmpi eq, %arg0, %c0_i32 : i32
    %1 = arith.extui %0 : i1 to i32
    %c0_i32_0 = arith.constant 0 : i32
    %2 = arith.cmpi ne, %1, %c0_i32_0 : i32
    scf.if %2 {
      %c0_31 = arith.constant 0 : index
      %c0_32 = arith.constant 0 : index
      %43 = vector.load %arg2[%c0_31, %c0_32] : memref<8x128xf32, #tpu.memory_space<vmem>>, vector<8x128xf32>
      %c0_33 = arith.constant 0 : index
      %c0_34 = arith.constant 0 : index
      %44 = vector.load %arg10[%c0_33, %c0_34] : memref<8x128xf32, #tpu.memory_space<vmem>>, vector<8x128xf32>
      tpu.vector_store %arg10[%c0_33, %c0_34], %43 {strides = array<i32>} : memref<8x128xf32, #tpu.memory_space<vmem>>, vector<8x128xf32>,
      %c0_35 = arith.constant 0 : index
      %c0_36 = arith.constant 0 : index
      %45 = vector.load %arg3[%c0_35, %c0_36] : memref<8x128xf32, #tpu.memory_space<vmem>>, vector<8x128xf32>
      %c0_37 = arith.constant 0 : index
      %c0_38 = arith.constant 0 : index
      %46 = vector.load %arg11[%c0_37, %c0_38] : memref<8x128xf32, #tpu.memory_space<vmem>>, vector<8x128xf32>
      tpu.vector_store %arg11[%c0_37, %c0_38], %45 {strides = array<i32>} : memref<8x128xf32, #tpu.memory_space<vmem>>, vector<8x128xf32>,
    } else {
    }
    %c0 = arith.constant 0 : index
    %c0_1 = arith.constant 0 : index
    %c0_2 = arith.constant 0 : index
    %3 = vector.load %arg1[%c0, %c0_1, %c0_2] : memref<1x8x256xbf16, #tpu.memory_space<vmem>>, vector<1x8x256xbf16>
    %4 = vector.shape_cast %3 : vector<1x8x256xbf16> to vector<8x256xbf16>
    %c0_3 = arith.constant 0 : index
    %c0_4 = arith.constant 0 : index
    %5 = vector.load %arg10[%c0_3, %c0_4] : memref<8x128xf32, #tpu.memory_space<vmem>>, vector<8x128xf32>
    %c0_5 = arith.constant 0 : index
    %c0_6 = arith.constant 0 : index
    %6 = vector.load %arg11[%c0_5, %c0_6] : memref<8x128xf32, #tpu.memory_space<vmem>>, vector<8x128xf32>
    %c0_7 = arith.constant 0 : index
    %c0_8 = arith.constant 0 : index
    %7 = vector.load %arg4[%c0_7, %c0_8] : memref<256x256xbf16, #tpu.memory_space<vmem>>, vector<256x256xbf16>
    %cst = arith.constant dense<0.000000e+00> : vector<8x256xf32>
    %8 = tpu.matmul %4, %7, %cst {dimension_numbers = #tpu.dot_dimension_numbers<[1], [0], [0], [1], [0, 0, 1, 1], [], []>} : vector<8x256xbf16>, vector<256x256xbf16>, vector<8x256xf32> -> vector<8x256xf32>
    %9 = vector.extract_strided_slice %8 {offsets = [0, 0], sizes = [8, 128], strides = [1, 1]} : vector<8x256xf32> to vector<8x128xf32>
    %10 = vector.extract_strided_slice %8 {offsets = [0, 128], sizes = [8, 128], strides = [1, 1]} : vector<8x256xf32> to vector<8x128xf32>
    %cst_9 = arith.constant 5.000000e-01 : f32
    %11 = vector.broadcast %cst_9 : f32 to vector<8x128xf32>
    %12 = arith.mulf %11, %10 : vector<8x128xf32>
    %cst_10 = arith.constant 5.000000e-01 : f32
    %13 = vector.broadcast %cst_10 : f32 to vector<8x128xf32>
    %14 = arith.mulf %13, %6 : vector<8x128xf32>
    %15 = arith.addf %12, %14 : vector<8x128xf32>
    %16 = arith.truncf %5 : vector<8x128xf32> to vector<8x128xbf16>
    %c0_11 = arith.constant 0 : index
    %c0_12 = arith.constant 0 : index
    %17 = vector.load %arg6[%c0_11, %c0_12] : memref<128x128xbf16, #tpu.memory_space<vmem>>, vector<128x128xbf16>
    %cst_13 = arith.constant dense<0.000000e+00> : vector<8x128xf32>
    %18 = tpu.matmul %16, %17, %cst_13 {dimension_numbers = #tpu.dot_dimension_numbers<[1], [0], [0], [1], [0, 0, 1, 1], [], []>} : vector<8x128xbf16>, vector<128x128xbf16>, vector<8x128xf32> -> vector<8x128xf32>
    %19 = arith.truncf %15 : vector<8x128xf32> to vector<8x128xbf16>
    %c0_14 = arith.constant 0 : index
    %c0_15 = arith.constant 0 : index
    %20 = vector.load %arg5[%c0_14, %c0_15] : memref<128x256xbf16, #tpu.memory_space<vmem>>, vector<128x256xbf16>
    %cst_16 = arith.constant dense<0.000000e+00> : vector<8x256xf32>
    %21 = tpu.matmul %19, %20, %cst_16 {dimension_numbers = #tpu.dot_dimension_numbers<[1], [0], [0], [1], [0, 0, 1, 1], [], []>} : vector<8x128xbf16>, vector<128x256xbf16>, vector<8x256xf32> -> vector<8x256xf32>
    %22 = vector.extract_strided_slice %21 {offsets = [0, 0], sizes = [8, 128], strides = [1, 1]} : vector<8x256xf32> to vector<8x128xf32>
    %23 = vector.extract_strided_slice %21 {offsets = [0, 128], sizes = [8, 128], strides = [1, 1]} : vector<8x256xf32> to vector<8x128xf32>
    %24 = arith.addf %22, %9 : vector<8x128xf32>
    %25 = arith.addf %24, %18 : vector<8x128xf32>
    %26 = arith.negf %25 : vector<8x128xf32>
    %27 = math.exp %26 : vector<8x128xf32>
    %cst_17 = arith.constant 1.000000e+00 : f32
    %28 = vector.broadcast %cst_17 : f32 to vector<8x128xf32>
    %29 = arith.addf %28, %27 : vector<8x128xf32>
    %30 = arith.divf %28, %29 : vector<8x128xf32>
    %31 = arith.truncf %30 : vector<8x128xf32> to vector<8x128xbf16>
    %c0_18 = arith.constant 0 : index
    %c0_19 = arith.constant 0 : index
    %32 = vector.load %arg7[%c0_18, %c0_19] : memref<128x128xbf16, #tpu.memory_space<vmem>>, vector<128x128xbf16>
    %cst_20 = arith.constant dense<0.000000e+00> : vector<8x128xf32>
    %33 = tpu.matmul %31, %32, %cst_20 {dimension_numbers = #tpu.dot_dimension_numbers<[1], [0], [0], [1], [0, 0, 1, 1], [], []>} : vector<8x128xbf16>, vector<128x128xbf16>, vector<8x128xf32> -> vector<8x128xf32>
    %34 = arith.addf %33, %23 : vector<8x128xf32>
    %c0_21 = arith.constant 0 : index
    %c0_22 = arith.constant 0 : index
    %c0_23 = arith.constant 0 : index
    %35 = vector.load %arg8[%c0_21, %c0_22, %c0_23] : memref<1x8x128xf32, #tpu.memory_space<vmem>>, vector<1x8x128xf32>
    %36 = vector.shape_cast %35 : vector<1x8x128xf32> to vector<8x128xf32>
    %37 = vector.shape_cast %34 : vector<8x128xf32> to vector<1x8x128xf32>
    tpu.vector_store %arg8[%c0_21, %c0_22, %c0_23], %37 {strides = array<i32>} : memref<1x8x128xf32, #tpu.memory_space<vmem>>, vector<1x8x128xf32>,
    %c0_24 = arith.constant 0 : index
    %c0_25 = arith.constant 0 : index
    %c0_26 = arith.constant 0 : index
    %38 = vector.load %arg9[%c0_24, %c0_25, %c0_26] : memref<1x8x128xf32, #tpu.memory_space<vmem>>, vector<1x8x128xf32>
    %39 = vector.shape_cast %38 : vector<1x8x128xf32> to vector<8x128xf32>
    %40 = vector.shape_cast %15 : vector<8x128xf32> to vector<1x8x128xf32>
    tpu.vector_store %arg9[%c0_24, %c0_25, %c0_26], %40 {strides = array<i32>} : memref<1x8x128xf32, #tpu.memory_space<vmem>>, vector<1x8x128xf32>,
    %c0_27 = arith.constant 0 : index
    %c0_28 = arith.constant 0 : index
    %41 = vector.load %arg10[%c0_27, %c0_28] : memref<8x128xf32, #tpu.memory_space<vmem>>, vector<8x128xf32>
    tpu.vector_store %arg10[%c0_27, %c0_28], %34 {strides = array<i32>} : memref<8x128xf32, #tpu.memory_space<vmem>>, vector<8x128xf32>,
    %c0_29 = arith.constant 0 : index
    %c0_30 = arith.constant 0 : index
    %42 = vector.load %arg11[%c0_29, %c0_30] : memref<8x128xf32, #tpu.memory_space<vmem>>, vector<8x128xf32>
    tpu.vector_store %arg11[%c0_29, %c0_30], %15 {strides = array<i32>} : memref<8x128xf32, #tpu.memory_space<vmem>>, vector<8x128xf32>,
    return
  }
  func.func @transform_0(%arg0: i32) -> (i32, i32, i32) {
    %c0_i32 = arith.constant 0 : i32
    %c0_i32_0 = arith.constant 0 : i32
    %c0_i32_1 = arith.constant 0 : i32
    return %arg0, %c0_i32, %c0_i32_0 : i32, i32, i32
  }
  func.func @transform_1(%arg0: i32) -> (i32, i32) {
    %c0_i32 = arith.constant 0 : i32
    %c0_i32_0 = arith.constant 0 : i32
    %c0_i32_1 = arith.constant 0 : i32
    return %c0_i32, %c0_i32_0 : i32, i32
  }
  func.func @transform_2(%arg0: i32) -> (i32, i32) {
    %c0_i32 = arith.constant 0 : i32
    %c0_i32_0 = arith.constant 0 : i32
    %c0_i32_1 = arith.constant 0 : i32
    return %c0_i32, %c0_i32_0 : i32, i32
  }
  func.func @transform_3(%arg0: i32) -> (i32, i32) {
    %c0_i32 = arith.constant 0 : i32
    %c0_i32_0 = arith.constant 0 : i32
    %c0_i32_1 = arith.constant 0 : i32
    return %c0_i32, %c0_i32_0 : i32, i32
  }
  func.func @transform_4(%arg0: i32) -> (i32, i32) {
    %c0_i32 = arith.constant 0 : i32
    %c0_i32_0 = arith.constant 0 : i32
    %c0_i32_1 = arith.constant 0 : i32
    return %c0_i32, %c0_i32_0 : i32, i32
  }
  func.func @transform_5(%arg0: i32) -> (i32, i32) {
    %c0_i32 = arith.constant 0 : i32
    %c0_i32_0 = arith.constant 0 : i32
    %c0_i32_1 = arith.constant 0 : i32
    return %c0_i32, %c0_i32_0 : i32, i32
  }
  func.func @transform_6(%arg0: i32) -> (i32, i32) {
    %c0_i32 = arith.constant 0 : i32
    %c0_i32_0 = arith.constant 0 : i32
    %c0_i32_1 = arith.constant 0 : i32
    return %c0_i32, %c0_i32_0 : i32, i32
  }
  func.func @transform_7(%arg0: i32) -> (i32, i32, i32) {
    %c0_i32 = arith.constant 0 : i32
    %c0_i32_0 = arith.constant 0 : i32
    %c0_i32_1 = arith.constant 0 : i32
    return %arg0, %c0_i32, %c0_i32_0 : i32, i32, i32
  }
  func.func @transform_8(%arg0: i32) -> (i32, i32, i32) {
    %c0_i32 = arith.constant 0 : i32
    %c0_i32_0 = arith.constant 0 : i32
    %c0_i32_1 = arith.constant 0 : i32
    return %arg0, %c0_i32, %c0_i32_0 : i32, i32, i32
  }
}

</mosaic_0001>

<bundles_post_ra>
// kernel: tpu_custom_call.1
= control target key start
LH: loop header
LB: loop body
LE: loop exit
PB: predicated region body
PF: predicated region fallthrough
CT: control target
= control target key end

     0   :  { %14 = vsyncpa [#allocation5], 0  ;;  %s1425_s0 = inlined_call_operand.hbm [shape: bf16[1,8,256], index: 0, kind: input, shape index: {}]   ;;  %s1426_s1 = inlined_call_operand.hbm [shape: f32[8,128], index: 1, kind: input, shape index: {}]   ;;  %s1427_s2 = inlined_call_operand.hbm [shape: f32[8,128], index: 2, kind: input, shape index: {}]   ;;  %s1428_s3 = inlined_call_operand.hbm [shape: bf16[256,256], index: 3, kind: input, shape index: {}]   ;;  %s1429_s4 = inlined_call_operand.hbm [shape: bf16[128,256], index: 4, kind: input, shape index: {}]   ;;  %s1430_s5 = inlined_call_operand.hbm [shape: bf16[128,128], index: 5, kind: input, shape index: {}]   ;;  %s1431_s6 = inlined_call_operand.hbm [shape: bf16[128,128], index: 6, kind: input, shape index: {}]   ;;  %s1432_s7 = inlined_call_operand.hbm [shape: f32[1,8,128], index: 7, kind: output, shape index: {0}]   ;;  %s1433_s8 = inlined_call_operand.hbm [shape: f32[1,8,128], index: 8, kind: output, shape index: {1}]  }
   0x1   :  { %15 = vsyncpa [#allocation8], 0 }
   0x2   :  { %16 = vsyncpa [#allocation11], 0 }
   0x3   :  { %17 = vsyncpa [#allocation14], 0 }
   0x4   :  { %18 = vsyncpa [#allocation6], 0 }
   0x5   :  { %19 = vsyncpa [#allocation18], 0  ;;  %s1211_s27 = smov [#allocation7]   ;;  %s1212_s29 = smov [#allocation10]  }
   0x6   :  { %s36_s28 = sshll.u32 %s1211_s27, 4  ;;  %s55_s30 = sshll.u32 %s1212_s29, 4  ;;  %s37_s28 = int_to_ptr.vmem [resolvable:$true] %s36_s28  ;;  %s1272_s30 = int_to_ptr.vmem [resolvable:$true] %s55_s30 }
   0x7   :  { %s1001_s11 = scalar_lea.hbm %s1426_s1, 128 }
   0x8   :  { %p1002_p0 = scmp.ne.s32.totalorder %s1426_s1, %s1001_s11  ;;  %p1005_p1 = scmp.lt.u32.totalorder %s1001_s11, %s1426_s1 }
   0xa   :  { %p1007_p2 = pnand %p1005_p1, %p1002_p0 }
   0xc   :  { %1010 = shalt.err (!%p1007_p2)
}
   0xd   :  { %s1011_s16 = scalar_lea.vmem %s37_s28, 128  ;;  %p1016_p4 = scmp.lt.s32.totalorder %s37_s28, %s37_s28 }
   0xe   :  { %p1012_p3 = scmp.ne.s32.totalorder %s37_s28, %s1011_s16  ;;  %p1017_p5 = scmp.lt.s32.totalorder %s1011_s16, %s1011_s16 }
  0x10   :  { %p1018_p6 = por %p1017_p5, %p1016_p4 }
  0x12   :  { %p1019_p7 = pnand %p1018_p6, %p1012_p3 }
  0x14   :  { %1022 = shalt.err (!%p1019_p7)
}
  0x15   :  { %39 = dma.hbm_to_vmem [thread:$0]  %s1426_s1, 128, %s37_s28, [#allocation8]  }
  0x16   :  { %s1023_s21 = scalar_lea.hbm %s1428_s3, 4096 }
  0x17   :  { %p1024_p8 = scmp.ne.s32.totalorder %s1428_s3, %s1023_s21  ;;  %p1027_p9 = scmp.lt.u32.totalorder %s1023_s21, %s1428_s3 }
  0x19   :  { %p1029_p10 = pnand %p1027_p9, %p1024_p8 }
  0x1b   :  { %1032 = shalt.err (!%p1029_p10)
}
  0x1c   :  { %s1033_s26 = scalar_lea.vmem %s1272_s30, 4096  ;;  %p1038_p12 = scmp.lt.s32.totalorder %s1272_s30, %s1272_s30 }
  0x1d   :  { %p1034_p11 = scmp.ne.s32.totalorder %s1272_s30, %s1033_s26  ;;  %p1039_p13 = scmp.lt.s32.totalorder %s1033_s26, %s1033_s26 }
  0x1f   :  { %p1040_p0 = por %p1039_p13, %p1038_p12 }
  0x21   :  { %p1041_p1 = pnand %p1040_p0, %p1034_p11 }
  0x23   :  { %1044 = shalt.err (!%p1041_p1)
}
  0x24   :  { %s1213_s1 = smov 128   ;;  %s1214_s27 = smov 8  }
  0x25   :  { %61 = dma.hbm_to_vmem [thread:$0]  %s1428_s3, 4096, %s1272_s30, [#allocation11], %s1213_s1, %s1213_s1, %s1214_s27  }
  0x26   :  { %s1215_s9 = smov [#allocation13]   ;;  %s1045_s13 = scalar_lea.hbm %s1430_s5, 1024 }
  0x27   :  { %s79_s10 = sshll.u32 %s1215_s9, 4  ;;  %p1046_p2 = scmp.ne.s32.totalorder %s1430_s5, %s1045_s13  ;;  %s80_s10 = int_to_ptr.vmem [resolvable:$true] %s79_s10 }
  0x28   :  { %p1049_p3 = scmp.lt.u32.totalorder %s1045_s13, %s1430_s5 }
  0x2a   :  { %p1051_p4 = pnand %p1049_p3, %p1046_p2 }
  0x2c   :  { %1054 = shalt.err (!%p1051_p4)
}
  0x2d   :  { %s1055_s18 = scalar_lea.vmem %s80_s10, 1024  ;;  %p1060_p6 = scmp.lt.s32.totalorder %s80_s10, %s80_s10 }
  0x2e   :  { %p1056_p5 = scmp.ne.s32.totalorder %s80_s10, %s1055_s18  ;;  %p1061_p7 = scmp.lt.s32.totalorder %s1055_s18, %s1055_s18 }
  0x30   :  { %p1062_p8 = por %p1061_p7, %p1060_p6 }
  0x32   :  { %p1063_p9 = pnand %p1062_p8, %p1056_p5 }
  0x34   :  { %1066 = shalt.err (!%p1063_p9)
}
  0x35   :  { %s1216_s3 = smov 64   ;;  %s1217_s30 = smov 4  }
  0x36   :  { %85 = dma.hbm_to_vmem [thread:$0]  %s1430_s5, 1024, %s80_s10, [#allocation14], %s1216_s3, %s1216_s3, %s1217_s30  }
  0x37   :  { %s1218_s21 = smov [#allocation4]   ;;  %s1219_s23 = smov [#allocation9]  }
  0x38   :  { %s26_s22 = sshll.u32 %s1218_s21, 4  ;;  %s46_s24 = sshll.u32 %s1219_s23, 4  ;;  %s27_s22 = int_to_ptr.vmem [resolvable:$true] %s26_s22  ;;  %s47_s24 = int_to_ptr.vmem [resolvable:$true] %s46_s24 }
  0x39   :  { %s1067_s28 = scalar_lea.hbm %s1425_s0, 128 }
  0x3a   :  { %p1068_p10 = scmp.ne.s32.totalorder %s1425_s0, %s1067_s28  ;;  %p1071_p11 = scmp.lt.u32.totalorder %s1067_s28, %s1425_s0 }
  0x3c   :  { %p1073_p12 = pnand %p1071_p11, %p1068_p10 }
  0x3e   :  { %1076 = shalt.err (!%p1073_p12)
}
  0x3f   :  { %s1077_s5 = scalar_lea.vmem %s27_s22, 128  ;;  %p1082_p0 = scmp.lt.s32.totalorder %s27_s22, %s27_s22 }
  0x40   :  { %p1078_p13 = scmp.ne.s32.totalorder %s27_s22, %s1077_s5  ;;  %p1083_p1 = scmp.lt.s32.totalorder %s1077_s5, %s1077_s5 }
  0x42   :  { %p1084_p2 = por %p1083_p1, %p1082_p0 }
  0x44   :  { %p1085_p3 = pnand %p1084_p2, %p1078_p13 }
  0x46   :  { %1088 = shalt.err (!%p1085_p3)
}
  0x47   :  { %29 = dma.hbm_to_vmem [thread:$0]  %s1425_s0, 128, %s27_s22, [#allocation5]  }
  0x48   :  { %s1089_s16 = scalar_lea.hbm %s1427_s2, 128 }
  0x49   :  { %p1090_p4 = scmp.ne.s32.totalorder %s1427_s2, %s1089_s16  ;;  %p1093_p5 = scmp.lt.u32.totalorder %s1089_s16, %s1427_s2 }
  0x4b   :  { %p1095_p6 = pnand %p1093_p5, %p1090_p4 }
  0x4d   :  { %1098 = shalt.err (!%p1095_p6)
}
  0x4e   :  { %s1099_s21 = scalar_lea.vmem %s47_s24, 128  ;;  %p1104_p8 = scmp.lt.s32.totalorder %s47_s24, %s47_s24 }
  0x4f   :  { %p1100_p7 = scmp.ne.s32.totalorder %s47_s24, %s1099_s21  ;;  %p1105_p9 = scmp.lt.s32.totalorder %s1099_s21, %s1099_s21 }
  0x51   :  { %p1106_p10 = por %p1105_p9, %p1104_p8 }
  0x53   :  { %p1107_p11 = pnand %p1106_p10, %p1100_p7 }
  0x55   :  { %1110 = shalt.err (!%p1107_p11)
}
  0x56   :  { %49 = dma.hbm_to_vmem [thread:$0]  %s1427_s2, 128, %s47_s24, [#allocation8]  }
  0x57   :  { %s1220_s23 = smov [#allocation12]   ;;  %s1221_s26 = smov [#allocation15]  }
  0x58   :  { %s67_s25 = sshll.u32 %s1220_s23, 4  ;;  %s91_s28 = sshll.u32 %s1221_s26, 4  ;;  %s68_s25 = int_to_ptr.vmem [resolvable:$true] %s67_s25  ;;  %s92_s28 = int_to_ptr.vmem [resolvable:$true] %s91_s28 }
  0x59   :  { %s1111_s11 = scalar_lea.hbm %s1429_s4, 2048 }
  0x5a   :  { %p1112_p12 = scmp.ne.s32.totalorder %s1429_s4, %s1111_s11  ;;  %p1115_p13 = scmp.lt.u32.totalorder %s1111_s11, %s1429_s4 }
  0x5c   :  { %p1117_p0 = pnand %p1115_p13, %p1112_p12 }
  0x5e   :  { %1120 = shalt.err (!%p1117_p0)
}
  0x5f   :  { %s1121_s2 = scalar_lea.vmem %s68_s25, 2048  ;;  %p1126_p2 = scmp.lt.s32.totalorder %s68_s25, %s68_s25 }
  0x60   :  { %p1122_p1 = scmp.ne.s32.totalorder %s68_s25, %s1121_s2  ;;  %p1127_p3 = scmp.lt.s32.totalorder %s1121_s2, %s1121_s2 }
  0x62   :  { %p1128_p4 = por %p1127_p3, %p1126_p2 }
  0x64   :  { %p1129_p5 = pnand %p1128_p4, %p1122_p1 }
  0x66   :  { %1132 = shalt.err (!%p1129_p5)
}
  0x67   :  { %73 = dma.hbm_to_vmem [thread:$0]  %s1429_s4, 2048, %s68_s25, [#allocation11], %s1213_s1, %s1213_s1, %s1214_s27  }
  0x68   :  { %s1133_s17 = scalar_lea.hbm %s1431_s6, 1024 }
  0x69   :  { %p1134_p6 = scmp.ne.s32.totalorder %s1431_s6, %s1133_s17  ;;  %p1137_p7 = scmp.lt.u32.totalorder %s1133_s17, %s1431_s6 }
  0x6b   :  { %p1139_p8 = pnand %p1137_p7, %p1134_p6 }
  0x6d   :  { %1142 = shalt.err (!%p1139_p8)
}
  0x6e   :  { %s1143_s0 = scalar_lea.vmem %s92_s28, 1024  ;;  %p1148_p10 = scmp.lt.s32.totalorder %s92_s28, %s92_s28 }
  0x6f   :  { %p1144_p9 = scmp.ne.s32.totalorder %s92_s28, %s1143_s0  ;;  %p1149_p11 = scmp.lt.s32.totalorder %s1143_s0, %s1143_s0 }
  0x71   :  { %p1150_p12 = por %p1149_p11, %p1148_p10 }
  0x73   :  { %p1151_p13 = pnand %p1150_p12, %p1144_p9 }
  0x75   :  { %1154 = shalt.err (!%p1151_p13)
}
  0x76   :  { %97 = dma.hbm_to_vmem [thread:$0]  %s1431_s6, 1024, %s92_s28, [#allocation14], %s1216_s3, %s1216_s3, %s1217_s30  }
  0x77   :  { %1199 = dma.done.wait [#allocation5], 128  }
  0x78   :  { %1200 = vsyncadd [#allocation5], 4294967168 }
  0x79   :  { %1201 = dma.done.wait [#allocation8], 256  }
  0x7a   :  { %1202 = vsyncadd [#allocation8], 4294967040 }
  0x7b   :  { %1203 = dma.done.wait [#allocation11], 6144  }
  0x7c   :  { %1204 = vsyncadd [#allocation11], 4294961152 }
  0x7d   :  { %1205 = dma.done.wait [#allocation14], 2048  }
  0x7e   :  { %1206 = vsyncadd [#allocation14], 4294965248  ;;  %v1222_v0 = vmov 0.0   ;;  %vm1223_vm0 = vmmov 0   ;;  %v907_v1 = vld [vmem:[#allocation10 + $0x4] ss:$8 sps:$4 sm:$0xff]  }
  0x7f   :  { %851 = vmatprep.subr.bf16.mxu1 %v1222_v0  ;;  %867 = vmatprep.mubr.msk.bf16.mxu1 %vm1223_vm0, %v1222_v0  ;;  %v909_v2 = vld [vmem:[#allocation10] ss:$8 sps:$4 sm:$0xff]   ;;  %v910_v3 = vld [vmem:[#allocation10 + $0x14] ss:$8 sps:$4 sm:$0xff]   ;;  %v912_v4 = vld [vmem:[#allocation10 + $0x10] ss:$8 sps:$4 sm:$0xff]  }
  0x80   :  { %330 = vmatprep.subr.bf16.mxu0 %v907_v1  ;;  %v913_v5 = vld [vmem:[#allocation10 + $0x24] ss:$8 sps:$4 sm:$0xff]   ;;  %v915_v6 = vld [vmem:[#allocation10 + $0x20] ss:$8 sps:$4 sm:$0xff]   ;;  %v916_v7 = vld [vmem:[#allocation10 + $0x34] ss:$8 sps:$4 sm:$0xff]  }
  0x81   :  { %331 = vmatpush1.bf16.msra.mxu0 %v909_v2  ;;  %v918_v8 = vld [vmem:[#allocation10 + $0x30] ss:$8 sps:$4 sm:$0xff]   ;;  %v919_v9 = vld [vmem:[#allocation10 + $0x44] ss:$8 sps:$4 sm:$0xff]   ;;  %v921_v10 = vld [vmem:[#allocation10 + $0x40] ss:$8 sps:$4 sm:$0xff]  }
  0x82   :  { %332 = vmatprep.subr.bf16.mxu0 %v910_v3  ;;  %v922_v11 = vld [vmem:[#allocation10 + $0x54] ss:$8 sps:$4 sm:$0xff]   ;;  %v924_v12 = vld [vmem:[#allocation10 + $0x50] ss:$8 sps:$4 sm:$0xff]   ;;  %v925_v13 = vld [vmem:[#allocation10 + $0x64] ss:$8 sps:$4 sm:$0xff]  }
  0x83   :  { %v1378_v14 = vld [vmem:[#allocation4] sm:$0xff]  ;;  %v957_v16 = vld [vmem:[#allocation13] sm:$0xff]   ;;  %v928_v18 = vld [vmem:[#allocation10 + $0x74] ss:$8 sps:$4 sm:$0xff]   ;;  %v1224_v62 = vmov 0   ;;  %s1225_s6 = smov [#allocation17]  }
  0x84   :  { %v767_v15 = vcombine.high %v1378_v14, %v1378_v14  ;;  %v927_v17 = vld [vmem:[#allocation10 + $0x60] ss:$8 sps:$4 sm:$0xff]   ;;  %852 = vmatpush3.bf16.msra.mxu1 %v957_v16  ;;  %v930_v20 = vld [vmem:[#allocation10 + $0x70] ss:$8 sps:$4 sm:$0xff]   ;;  %v931_v21 = vld [vmem:[#allocation10 + $0x84] ss:$8 sps:$4 sm:$0xff]   ;;  %v766_v51 = vcombine.low %v1378_v14, %v1378_v14 }
  0x85   :  { %333 = vmatpush1.bf16.msra.mxu0 %v912_v4  ;;  %v958_v19 = vld [vmem:[#allocation13 + $0x8] sm:$0xff]   ;;  %853 = vmatprep.subr.bf16.mxu1 %v1222_v0  ;;  %v959_v22 = vld [vmem:[#allocation13 + $0x10] sm:$0xff]   ;;  %v960_v25 = vld [vmem:[#allocation13 + $0x18] sm:$0xff]   ;;  %s750_s27 = sshll.u32 %s1225_s6, 4  ;;  %s751_s27 = int_to_ptr.vmem [resolvable:$true] %s750_s27 }
  0x86   :  { %334 = vmatprep.subr.bf16.mxu0 %v913_v5  ;;  %362 = vmatprep.mubr.bf16.mxu0 %v767_v15  ;;  %v933_v23 = vld [vmem:[#allocation10 + $0x80] ss:$8 sps:$4 sm:$0xff]   ;;  %v934_v24 = vld [vmem:[#allocation10 + $0x94] ss:$8 sps:$4 sm:$0xff]   ;;  %v936_v26 = vld [vmem:[#allocation10 + $0x90] ss:$8 sps:$4 sm:$0xff]   ;;  %p1160_p1 = scmp.lt.s32.totalorder %s751_s27, %s751_s27 }
  0x87   :  { %v937_v27 = vld [vmem:[#allocation10 + $0xa4] ss:$8 sps:$4 sm:$0xff]   ;;  %v939_v28 = vld [vmem:[#allocation10 + $0xa0] ss:$8 sps:$4 sm:$0xff]   ;;  %v940_v30 = vld [vmem:[#allocation10 + $0xb4] ss:$8 sps:$4 sm:$0xff]  }
  0x88   :  { %854 = vmatpush3.bf16.msra.mxu1 %v958_v19  ;;  %v961_v29 = vld [vmem:[#allocation13 + $0x20] sm:$0xff]   ;;  %v962_v31 = vld [vmem:[#allocation13 + $0x28] sm:$0xff]   ;;  %v942_v32 = vld [vmem:[#allocation10 + $0xb0] ss:$8 sps:$4 sm:$0xff]   ;;  %s1155_s3 = scalar_lea.vmem %s751_s27, 128 }
  0x89   :  { %335 = vmatpush1.bf16.msra.mxu0 %v915_v6  ;;  %855 = vmatprep.subr.bf16.mxu1 %v1222_v0  ;;  %v943_v33 = vld [vmem:[#allocation10 + $0xc4] ss:$8 sps:$4 sm:$0xff]   ;;  %v963_v34 = vld [vmem:[#allocation13 + $0x30] sm:$0xff]   ;;  %v945_v35 = vld [vmem:[#allocation10 + $0xc0] ss:$8 sps:$4 sm:$0xff]   ;;  %p1156_p0 = scmp.ne.s32.totalorder %s751_s27, %s1155_s3  ;;  %p1161_p2 = scmp.lt.s32.totalorder %s1155_s3, %s1155_s3 }
  0x8a   :  { %336 = vmatprep.subr.bf16.mxu0 %v916_v7  ;;  %v946_v36 = vld [vmem:[#allocation10 + $0xd4] ss:$8 sps:$4 sm:$0xff]   ;;  %v967_v39 = vld [vmem:[#allocation12 + $0x4] ss:$8 sps:$4 sm:$0xff]   ;;  %v948_v40 = vld [vmem:[#allocation10 + $0xd0] ss:$8 sps:$4 sm:$0xff]  }
  0x8b   :  { %v964_v37 = vld [vmem:[#allocation13 + $0x38] sm:$0xff]   ;;  %v124_v38 = vld [vmem:[#allocation7] sm:$0xff]  ;;  %v949_v41 = vld [vmem:[#allocation10 + $0xe4] ss:$8 sps:$4 sm:$0xff]   ;;  %p1162_p3 = por %p1161_p2, %p1160_p1 }
  0x8c   :  { %856 = vmatpush3.bf16.msra.mxu1 %v959_v22  ;;  %v374_v42 = vpack.c.bf16 %v124_v38, %v124_v38  ;;  %v965_v43 = vld [vmem:[#allocation12] ss:$8 sps:$4 sm:$0xff]   ;;  %v970_v44 = vld [vmem:[#allocation12 + $0x14] ss:$8 sps:$4 sm:$0xff]   ;;  %v968_v47 = vld [vmem:[#allocation12 + $0x10] ss:$8 sps:$4 sm:$0xff]  }
  0x8d   :  { %337 = vmatpush1.bf16.msra.mxu0 %v918_v8  ;;  %857 = vmatprep.subr.bf16.mxu1 %v1222_v0  ;;  %v951_v45 = vld [vmem:[#allocation10 + $0xe0] ss:$8 sps:$4 sm:$0xff]   ;;  %v952_v46 = vld [vmem:[#allocation10 + $0xf4] ss:$8 sps:$4 sm:$0xff]   ;;  %v973_v48 = vld [vmem:[#allocation12 + $0x24] ss:$8 sps:$4 sm:$0xff]   ;;  %p1163_p4 = pnand %p1162_p3, %p1156_p0 }
  0x8e   :  { %338 = vmatprep.subr.bf16.mxu0 %v919_v9  ;;  %v954_v49 = vld [vmem:[#allocation10 + $0xf0] ss:$8 sps:$4 sm:$0xff]   ;;  %v971_v50 = vld [vmem:[#allocation12 + $0x20] ss:$8 sps:$4 sm:$0xff]   ;;  %v976_v52 = vld [vmem:[#allocation12 + $0x34] ss:$8 sps:$4 sm:$0xff]  }
  0x8f   :  { %v974_v53 = vld [vmem:[#allocation12 + $0x30] ss:$8 sps:$4 sm:$0xff]   ;;  %v979_v54 = vld [vmem:[#allocation12 + $0x44] ss:$8 sps:$4 sm:$0xff]   ;;  %v977_v55 = vld [vmem:[#allocation12 + $0x40] ss:$8 sps:$4 sm:$0xff]  }
  0x90   :  { %858 = vmatpush3.bf16.msra.mxu1 %v960_v25  ;;  %v982_v56 = vld [vmem:[#allocation12 + $0x54] ss:$8 sps:$4 sm:$0xff]   ;;  %v980_v57 = vld [vmem:[#allocation12 + $0x50] ss:$8 sps:$4 sm:$0xff]   ;;  %v985_v58 = vld [vmem:[#allocation12 + $0x64] ss:$8 sps:$4 sm:$0xff]  }
  0x91   :  { %339 = vmatpush1.bf16.msra.mxu0 %v921_v10  ;;  %859 = vmatprep.subr.bf16.mxu1 %v1222_v0  ;;  %v983_v59 = vld [vmem:[#allocation12 + $0x60] ss:$8 sps:$4 sm:$0xff]   ;;  %v988_v60 = vld [vmem:[#allocation12 + $0x74] ss:$8 sps:$4 sm:$0xff]   ;;  %v986_v61 = vld [vmem:[#allocation12 + $0x70] ss:$8 sps:$4 sm:$0xff]  }
  0x92   :  { %340 = vmatprep.subr.bf16.mxu0 %v922_v11  ;;  %v126_v4 = vld [vmem:[#allocation9] sm:$0xff]  ;;  %v990_v14 = vld [vmem:[#allocation15 + $0x8] sm:$0xff]   ;;  %v991_v15 = vld [vmem:[#allocation15 + $0x10] sm:$0xff]  }
  0x93   :  { %v372_v6 = vmul.f32 0.5, %v126_v4  ;;  %v992_v16 = vld [vmem:[#allocation15 + $0x18] sm:$0xff]   ;;  %v995_v19 = vld [vmem:[#allocation15 + $0x30] sm:$0xff]  }
  0x94   :  { %860 = vmatpush3.bf16.msra.mxu1 %v961_v29 }
  0x95   :  { %341 = vmatpush1.bf16.msra.mxu0 %v924_v12  ;;  %861 = vmatprep.subr.bf16.mxu1 %v1222_v0 }
  0x96   :  { %342 = vmatprep.subr.bf16.mxu0 %v925_v13  ;;  %v989_v13 = vld [vmem:[#allocation15] sm:$0xff]  }
  0x98   :  { %862 = vmatpush3.bf16.msra.mxu1 %v962_v31 }
  0x99   :  { %343 = vmatpush1.bf16.msra.mxu0 %v927_v17  ;;  %863 = vmatprep.subr.bf16.mxu1 %v1222_v0  ;;  %v993_v17 = vld [vmem:[#allocation15 + $0x20] sm:$0xff]  }
  0x9a   :  { %344 = vmatprep.subr.bf16.mxu0 %v928_v18  ;;  %v994_v18 = vld [vmem:[#allocation15 + $0x28] sm:$0xff]  }
  0x9c   :  { %864 = vmatpush3.bf16.msra.mxu1 %v963_v34 }
  0x9d   :  { %345 = vmatpush1.bf16.msra.mxu0 %v930_v20  ;;  %865 = vmatprep.subr.bf16.mxu1 %v1222_v0  ;;  %v996_v20 = vld [vmem:[#allocation15 + $0x38] sm:$0xff]  }
  0x9e   :  { %346 = vmatprep.subr.bf16.mxu0 %v931_v21 }
  0xa0   :  { %866 = vmatpush3.bf16.msra.mxu1 %v964_v37 }
  0xa1   :  { %347 = vmatpush1.bf16.msra.mxu0 %v933_v23  ;;  %576 = vmatprep.subr.bf16.mxu1 %v967_v39 }
  0xa2   :  { %348 = vmatprep.subr.bf16.mxu0 %v934_v24 }
  0xa3   :  { %868 = vmatmul.mubr.bf16.vlgmr.msra.gmra.mrb[0].mxu1 %v374_v42 }
  0xa4   :  { %577 = vmatpush1.bf16.msra.mxu1 %v965_v43  ;;  %608 = vmatprep.mubr.bf16.mxu1 %v1224_v62 }
  0xa5   :  { %349 = vmatpush1.bf16.msra.mxu0 %v936_v26  ;;  %578 = vmatprep.subr.bf16.mxu1 %v970_v44 }
  0xa6   :  { %350 = vmatprep.subr.bf16.mxu0 %v937_v27 }
  0xa8   :  { %579 = vmatpush1.bf16.msra.mxu1 %v968_v47 }
  0xa9   :  { %351 = vmatpush1.bf16.msra.mxu0 %v939_v28  ;;  %580 = vmatprep.subr.bf16.mxu1 %v973_v48 }
  0xaa   :  { %352 = vmatprep.subr.bf16.mxu0 %v940_v30 }
  0xac   :  { %581 = vmatpush1.bf16.msra.mxu1 %v971_v50 }
  0xad   :  { %353 = vmatpush1.bf16.msra.mxu0 %v942_v32  ;;  %582 = vmatprep.subr.bf16.mxu1 %v976_v52 }
  0xae   :  { %354 = vmatprep.subr.bf16.mxu0 %v943_v33 }
  0xb0   :  { %583 = vmatpush1.bf16.msra.mxu1 %v974_v53 }
  0xb1   :  { %355 = vmatpush1.bf16.msra.mxu0 %v945_v35  ;;  %584 = vmatprep.subr.bf16.mxu1 %v979_v54 }
  0xb2   :  { %356 = vmatprep.subr.bf16.mxu0 %v946_v36 }
  0xb4   :  { %585 = vmatpush1.bf16.msra.mxu1 %v977_v55 }
  0xb5   :  { %357 = vmatpush1.bf16.msra.mxu0 %v948_v40  ;;  %586 = vmatprep.subr.bf16.mxu1 %v982_v56 }
  0xb6   :  { %358 = vmatprep.subr.bf16.mxu0 %v949_v41 }
  0xb8   :  { %587 = vmatpush1.bf16.msra.mxu1 %v980_v57 }
  0xb9   :  { %359 = vmatpush1.bf16.msra.mxu0 %v951_v45  ;;  %588 = vmatprep.subr.bf16.mxu1 %v985_v58 }
  0xba   :  { %360 = vmatprep.subr.bf16.mxu0 %v952_v46 }
  0xbc   :  { %589 = vmatpush1.bf16.msra.mxu1 %v983_v59 }
  0xbd   :  { %361 = vmatpush1.bf16.msra.mxu0 %v954_v49  ;;  %590 = vmatprep.subr.bf16.mxu1 %v988_v60 }
  0xbe   :  { %871 = vmatprep.subr.bf16.mxu0 %v1222_v0 }
  0xc0   :  { %363 = vmatmul.mubr.bf16.vlgmr.msra.gmra.mrb[0].mxu0 %v766_v51  ;;  %591 = vmatpush1.bf16.msra.mxu1 %v986_v61 }
  0xc1   :  { %887 = vmatprep.mubr.msk.bf16.mxu0 %vm1223_vm0, %v1222_v0  ;;  %872 = vmatpush3.bf16.msra.mxu0 %v989_v13 }
  0xc2   :  { %873 = vmatprep.subr.bf16.mxu0 %v1222_v0 }
  0xc5   :  { %874 = vmatpush3.bf16.msra.mxu0 %v990_v14 }
  0xc6   :  { %875 = vmatprep.subr.bf16.mxu0 %v1222_v0 }
  0xc9   :  { %876 = vmatpush3.bf16.msra.mxu0 %v991_v15 }
  0xca   :  { %877 = vmatprep.subr.bf16.mxu0 %v1222_v0 }
  0xcd   :  { %878 = vmatpush3.bf16.msra.mxu0 %v992_v16 }
  0xce   :  { %879 = vmatprep.subr.bf16.mxu0 %v1222_v0 }
  0xd1   :  { %880 = vmatpush3.bf16.msra.mxu0 %v993_v17 }
  0xd2   :  { %881 = vmatprep.subr.bf16.mxu0 %v1222_v0 }
  0xd5   :  { %882 = vmatpush3.bf16.msra.mxu0 %v994_v18 }
  0xd6   :  { %883 = vmatprep.subr.bf16.mxu0 %v1222_v0 }
  0xd9   :  { %884 = vmatpush3.bf16.msra.mxu0 %v995_v19 }
  0xda   :  { %885 = vmatprep.subr.bf16.mxu0 %v1222_v0 }
  0xdd   :  { %886 = vmatpush3.bf16.msra.mxu0 %v996_v20 }
 0x176   :  { %v473_v63 = vpop.f32.mrb[0].mxu1 }
 0x177   :  { %v869_v1 = vpop.f32.mrb[1].mxu1 }
 0x178   :  { %v476_v2 = vpop.f32.mrb[2].mxu1 }
 0x179   :  { %v870_v3 = vpop.f32.mrb[3].mxu1 }
 0x193   :  { %v364_v5 = vpop.f32.mrb[0].mxu0 }
 0x194   :  { %v366_v7 = vpop.f32.mrb[1].mxu0 }
 0x195   :  { %v371_v8 = vmul.f32 0.5, %v366_v7  ;;  %v368_v9 = vpop.f32.mrb[2].mxu0 }
 0x196   :  { %v369_v10 = vpop.f32.mrb[3].mxu0 }
 0x197   :  { %v373_v11 = vadd.f32 %v372_v6, %v371_v8 }
 0x199   :  { %v479_v12 = vpack.c.bf16 %v373_v11, %v373_v11  ;;  %731 = vst [vmem:[#allocation17] sm:$0xff] %v373_v11 }
 0x19b   :  { %609 = vmatmul.mubr.bf16.vlgmr.msra.gmra.mrb[4].mxu1 %v479_v12 }
 0x26e   :  { %v610_v21 = vpop.f32.mrb[4].mxu1 }
 0x26f   :  { %v617_v22 = vadd.f32 %v610_v21, %v364_v5  ;;  %v612_v23 = vpop.f32.mrb[5].mxu1 }
 0x270   :  { %v614_v24 = vpop.f32.mrb[6].mxu1 }
 0x271   :  { %v618_v25 = vadd.f32 %v617_v22, %v473_v63  ;;  %v615_v26 = vpop.f32.mrb[7].mxu1 }
 0x273   :  { %v824_v27 = vmul.f32 -1.442695, %v618_v25 }
 0x275   :  { %997 = vpow2.f32 %v824_v27 }
 0x27f   :  { %v998_v28 = vpop.eup %997 }
 0x280   :  { %v622_v29 = vadd.f32 1.0, %v998_v28 }
 0x282   :  { %999 = vrcp.f32 %v622_v29 }
 0x28c   :  { %v1000_v30 = vpop.eup %999 }
 0x28d   :  { %v625_v31 = vpack.c.bf16 %v1000_v30, %v1000_v30 }
 0x28f   :  { %888 = vmatmul.mubr.bf16.vlgmr.msra.gmra.mrb[4].mxu0 %v625_v31 }
 0x290   :  { %1166 = shalt.err (!%p1163_p4)
}
 0x291   :  { %s1167_s23 = scalar_lea.hbm %s1433_s8, 128 }
 0x292   :  { %p1168_p5 = scmp.ne.s32.totalorder %s1433_s8, %s1167_s23  ;;  %p1171_p6 = scmp.lt.u32.totalorder %s1167_s23, %s1433_s8 }
 0x294   :  { %p1173_p7 = pnand %p1171_p6, %p1168_p5 }
 0x296   :  { %1176 = shalt.err (!%p1173_p7)
}
 0x297   :  { %753 = dma.vmem_to_hbm [thread:$0]  %s751_s27, 128, %s1433_s8, [#allocation18]  }
 0x298   :  { %s1226_s12 = smov [#allocation16]  }
 0x299   :  { %s740_s5 = sshll.u32 %s1226_s12, 4  ;;  %s741_s5 = int_to_ptr.vmem [resolvable:$true] %s740_s5 }
 0x29a   :  { %s1177_s10 = scalar_lea.vmem %s741_s5, 128  ;;  %p1182_p9 = scmp.lt.s32.totalorder %s741_s5, %s741_s5 }
 0x29b   :  { %p1178_p8 = scmp.ne.s32.totalorder %s741_s5, %s1177_s10  ;;  %p1183_p10 = scmp.lt.s32.totalorder %s1177_s10, %s1177_s10 }
 0x29d   :  { %p1184_p11 = por %p1183_p10, %p1182_p9 }
 0x29f   :  { %p1185_p12 = pnand %p1184_p11, %p1178_p8 }
 0x362   :  { %v724_v0 = vpop.f32.mrb[4].mxu0 }
 0x363   :  { %v725_v32 = vadd.f32 %v724_v0, %v612_v23  ;;  %v889_v33 = vpop.f32.mrb[5].mxu0 }
 0x364   :  { %v727_v34 = vpop.f32.mrb[6].mxu0 }
 0x365   :  { %730 = vst [vmem:[#allocation16] sm:$0xff] %v725_v32  ;;  %v890_v35 = vpop.f32.mrb[7].mxu0 }
 0x366   :  { %1188 = shalt.err (!%p1185_p12)
}
 0x367   :  { %s1189_s8 = scalar_lea.hbm %s1432_s7, 128 }
 0x368   :  { %p1190_p13 = scmp.ne.s32.totalorder %s1432_s7, %s1189_s8  ;;  %p1193_p0 = scmp.lt.u32.totalorder %s1189_s8, %s1432_s7 }
 0x36a   :  { %p1195_p1 = pnand %p1193_p0, %p1190_p13 }
 0x36c   :  { %1198 = shalt.err (!%p1195_p1)
}
 0x36d   :  { %743 = dma.vmem_to_hbm [thread:$0]  %s741_s5, 128, %s1432_s7, [#allocation6]  }
 0x36e   :  { %1207 = dma.done.wait [#allocation6], 128  }
 0x36f   :  { %1208 = vsyncadd [#allocation6], 4294967168 }
 0x370   :  { %1209 = dma.done.wait [#allocation18], 128  }
 0x371   :  { %1210 = vsyncadd [#allocation18], 4294967168 }
 0x372   :  { %760 = vsyncpa [#allocation5], 1 }
 0x373   :  { %761 = vsyncpa [#allocation8], 1 }
 0x374   :  { %762 = vsyncpa [#allocation11], 1 }
 0x375   :  { %763 = vsyncpa [#allocation14], 1 }
 0x376   :  { %764 = vsyncpa [#allocation6], 1 }
 0x377   :  { %765 = vsyncpa [#allocation18], 1 }

</bundles_post_ra>
